<compile_context>
chip_gen: v5e
topology: v5e:2x2
jax: 0.10.0
libtpu: 0.0.40
codegen_flags: <defaults>
</compile_context>

<pallas_src>
import functools

import jax
import jax.numpy as jnp
from jax.experimental import pallas as pl
from jax.experimental.pallas import tpu as pltpu

STATE_SIZE = 33
ACTION_SIZE = 4
UNITS_FC1 = 256
UNITS_FC2 = 128
OUT_PAD = 128  # lane-dense output width; columns 4..127 are zero and sliced off

# Batch-tile cap.  ~83 KFLOP/row means the kernel is overhead/latency bound,
# so big tiles / few grid steps win.  At 2048 the f32 intermediates
# (tb*(256+128)*4B ~ 3 MiB) plus double-buffered x/out tiles stay well under
# every generation's scoped-VMEM budget (v5e 16 MiB default -> raised below,
# v7x 64 MiB physical).
DEFAULT_TB_CAP = 2048
VMEM_LIMIT_BYTES = 32 * 1024 * 1024


def _round_up(x, m):
    return (x + m - 1) // m * m


def _cdiv(a, b):
    return (a + b - 1) // b


def _choose_tile(batch, tb_cap):
    """Pick batch tile and grid length (all Python ints at trace time)."""
    tb = min(tb_cap, _round_up(batch, 16))  # 16-row alignment (bf16 sublane packing)
    steps = _cdiv(batch, tb)
    # v7x has 2 TensorCores sharing the grid: prefer an even step count for
    # load balance (best effort; a no-op for single-step grids).
    if steps > 1 and steps % 2 == 1:
        steps += 1
        tb = _round_up(_cdiv(batch, steps), 16)
        steps = _cdiv(batch, tb)
    return tb, steps


def actor_kernel(x_ref, w1_ref, b1_ref, w2_ref, b2_ref, w3_ref, b3_ref, out_ref):
    # Input tile arrives f32; cast to bf16 on the VPU (no wrapper pre-pass).
    x = x_ref[...].astype(jnp.bfloat16)
    # fc1 + ReLU (bf16 MXU operands, f32 accumulate / bias / activation)
    h1 = jnp.dot(x, w1_ref[...], preferred_element_type=jnp.float32)
    h1 = jnp.maximum(h1 + b1_ref[...], 0.0).astype(jnp.bfloat16)
    # fc2 + ReLU
    h2 = jnp.dot(h1, w2_ref[...], preferred_element_type=jnp.float32)
    h2 = jnp.maximum(h2 + b2_ref[...], 0.0).astype(jnp.bfloat16)
    # fc3 + tanh; w3/b3 are zero-padded to 128 output columns so the store is
    # lane-dense (padded columns compute tanh(0) = 0 and are sliced off).
    h3 = jnp.dot(h2, w3_ref[...], preferred_element_type=jnp.float32)
    out_ref[...] = jnp.tanh(h3 + b3_ref[...]).astype(out_ref.dtype)


@functools.partial(jax.jit, static_argnames=("tb_cap",))
def actor_forward(state, w1, b1, w2, b2, w3p, b3p, tb_cap=DEFAULT_TB_CAP):
    """state: (B, 33) f32; params already prepared by prepare_params()."""
    batch = state.shape[0]
    tb, steps = _choose_tile(batch, tb_cap)

    matmul_flops = 2 * batch * (
        STATE_SIZE * UNITS_FC1 + UNITS_FC1 * UNITS_FC2 + UNITS_FC2 * OUT_PAD
    )
    bytes_accessed = (
        batch * STATE_SIZE * 4                                   # f32 state in
        + batch * OUT_PAD * 4                                    # f32 padded out
        + 2 * (STATE_SIZE * UNITS_FC1 + UNITS_FC1 * UNITS_FC2
               + UNITS_FC2 * OUT_PAD)                            # bf16 weights
        + 4 * (UNITS_FC1 + UNITS_FC2 + OUT_PAD)                  # f32 biases
    )

    out = pl.pallas_call(
        actor_kernel,
        out_shape=jax.ShapeDtypeStruct((batch, OUT_PAD), jnp.float32),
        grid=(steps,),
        in_specs=[
            pl.BlockSpec((tb, STATE_SIZE), lambda i: (i, 0)),          # state tile
            pl.BlockSpec((STATE_SIZE, UNITS_FC1), lambda i: (0, 0)),   # w1 (resident)
            pl.BlockSpec((1, UNITS_FC1), lambda i: (0, 0)),            # b1
            pl.BlockSpec((UNITS_FC1, UNITS_FC2), lambda i: (0, 0)),    # w2
            pl.BlockSpec((1, UNITS_FC2), lambda i: (0, 0)),            # b2
            pl.BlockSpec((UNITS_FC2, OUT_PAD), lambda i: (0, 0)),      # w3 (padded)
            pl.BlockSpec((1, OUT_PAD), lambda i: (0, 0)),              # b3 (padded)
        ],
        out_specs=pl.BlockSpec((tb, OUT_PAD), lambda i: (i, 0)),
        compiler_params=pltpu.CompilerParams(
            dimension_semantics=("parallel",),
            vmem_limit_bytes=VMEM_LIMIT_BYTES,
        ),
        cost_estimate=pl.CostEstimate(
            flops=matmul_flops,
            transcendentals=batch * OUT_PAD,
            bytes_accessed=bytes_accessed,
        ),
    )(state, w1, b1, w2, b2, w3p, b3p)

    # Only the first ACTION_SIZE lanes carry real actions.
    return out[:, :ACTION_SIZE]


def init_params(key):
    """Deterministic init mirroring Actor.reset_parameters / PyTorch defaults.

    PyTorch weight is (out, in); hidden_init uses weight.size()[0] = out_features,
    so the weight uniform bound is 1/sqrt(out_features) for fc1/fc2 and 0.003 for
    fc3.  Biases keep the default Linear bound 1/sqrt(in_features).  Weights here
    are stored transposed as (in, out) so the hot path is `x @ W + b`.
    """
    ks = jax.random.split(key, 6)

    def u(k, shape, lim):
        return jax.random.uniform(k, shape, jnp.float32, minval=-lim, maxval=lim)

    w1 = u(ks[0], (STATE_SIZE, UNITS_FC1), 1.0 / jnp.sqrt(UNITS_FC1))
    b1 = u(ks[1], (1, UNITS_FC1), 1.0 / jnp.sqrt(STATE_SIZE))
    w2 = u(ks[2], (UNITS_FC1, UNITS_FC2), 1.0 / jnp.sqrt(UNITS_FC2))
    b2 = u(ks[3], (1, UNITS_FC2), 1.0 / jnp.sqrt(UNITS_FC1))
    w3 = u(ks[4], (UNITS_FC2, ACTION_SIZE), 0.003)
    b3 = u(ks[5], (1, ACTION_SIZE), 1.0 / jnp.sqrt(UNITS_FC2))
    return w1, b1, w2, b2, w3, b3


def prepare_params(params):
    """One-time prep: cast weights to bf16 and zero-pad fc3 to 128 output cols.

    Hoists the per-call cast/pad XLA ops out of the latency-bound hot path."""
    w1, b1, w2, b2, w3, b3 = params
    w3p = jnp.zeros((UNITS_FC2, OUT_PAD), jnp.float32).at[:, :ACTION_SIZE].set(w3)
    b3p = jnp.zeros((1, OUT_PAD), jnp.float32).at[:, :ACTION_SIZE].set(b3)
    return (
        w1.astype(jnp.bfloat16), b1,
        w2.astype(jnp.bfloat16), b2,
        w3p.astype(jnp.bfloat16), b3p,
    )


def _reference(state, params_f32):
    w1, b1, w2, b2, w3, b3 = params_f32
    h = jnp.maximum(state @ w1 + b1, 0.0)
    h = jnp.maximum(h @ w2 + b2, 0.0)
    return jnp.tanh(h @ w3 + b3)


if __name__ == "__main__":
    key = jax.random.PRNGKey(0)
    k_params, k_small, k_big = jax.random.split(key, 3)

    params_f32 = init_params(k_params)
    params = jax.tree_util.tree_map(jax.block_until_ready, prepare_params(params_f32))

    # Small-batch check (single grid step, ragged 8-row block inside a 16-row tile).
    batch = 8
    state = jax.random.normal(k_small, (batch, STATE_SIZE), jnp.float32)
    action = actor_forward(state, *params)
    jax.block_until_ready(action)
    assert action.shape == (batch, ACTION_SIZE)
    ref = _reference(state, params_f32)
    # bf16 MXU operands with f32 accumulation -> relaxed tolerance vs f32 ref.
    assert jnp.allclose(action, ref, atol=2e-2, rtol=2e-2), (
        float(jnp.max(jnp.abs(action - ref))))

    # Larger ragged batch: exercises multi-step grid + ragged final block
    # (tb=2048 -> 2 steps, second block covers only 952 valid rows).
    batch_big = 3000
    state_big = jax.random.normal(k_big, (batch_big, STATE_SIZE), jnp.float32)
    action_big = actor_forward(state_big, *params)
    jax.block_until_ready(action_big)
    assert action_big.shape == (batch_big, ACTION_SIZE)
    ref_big = _reference(state_big, params_f32)
    assert jnp.allclose(action_big, ref_big, atol=2e-2, rtol=2e-2), (
        float(jnp.max(jnp.abs(action_big - ref_big))))

    print("KERNEL_OK")
</pallas_src>

<mosaic_0001>
module attributes {stable_mosaic.version = 11 : i64} {
  func.func @actor_kernel(%arg0: i32, %arg1: memref<16x33xf32, #tpu.memory_space<vmem>>, %arg2: memref<33x256xbf16, #tpu.memory_space<vmem>>, %arg3: memref<1x256xf32, #tpu.memory_space<vmem>>, %arg4: memref<256x128xbf16, #tpu.memory_space<vmem>>, %arg5: memref<1x128xf32, #tpu.memory_space<vmem>>, %arg6: memref<128x128xbf16, #tpu.memory_space<vmem>>, %arg7: memref<1x128xf32, #tpu.memory_space<vmem>>, %arg8: memref<16x128xf32, #tpu.memory_space<vmem>>) attributes {dimension_semantics = [#tpu.dimension_semantics<parallel>], iteration_bounds = array<i64: 1>, scalar_prefetch = 0 : i64, scratch_operands = 0 : i64, tpu.core_type = #tpu.core_type<tc>, window_params = [{transform_indices = @transform_0, window_bounds = array<i64: 16, 33>}, {pipeline_mode = #tpu.pipeline_mode<synchronous>, transform_indices = @transform_1, window_bounds = array<i64: 33, 256>}, {pipeline_mode = #tpu.pipeline_mode<synchronous>, transform_indices = @transform_2, window_bounds = array<i64: 1, 256>}, {pipeline_mode = #tpu.pipeline_mode<synchronous>, transform_indices = @transform_3, window_bounds = array<i64: 256, 128>}, {pipeline_mode = #tpu.pipeline_mode<synchronous>, transform_indices = @transform_4, window_bounds = array<i64: 1, 128>}, {pipeline_mode = #tpu.pipeline_mode<synchronous>, transform_indices = @transform_5, window_bounds = array<i64: 128, 128>}, {pipeline_mode = #tpu.pipeline_mode<synchronous>, transform_indices = @transform_6, window_bounds = array<i64: 1, 128>}, {transform_indices = @transform_7, window_bounds = array<i64: 16, 128>}]} {
    %c0 = arith.constant 0 : index
    %c0_0 = arith.constant 0 : index
    %0 = vector.load %arg1[%c0, %c0_0] : memref<16x33xf32, #tpu.memory_space<vmem>>, vector<16x33xf32>
    %1 = arith.truncf %0 : vector<16x33xf32> to vector<16x33xbf16>
    %c0_1 = arith.constant 0 : index
    %c0_2 = arith.constant 0 : index
    %2 = vector.load %arg2[%c0_1, %c0_2] : memref<33x256xbf16, #tpu.memory_space<vmem>>, vector<33x256xbf16>
    %cst = arith.constant dense<0.000000e+00> : vector<16x256xf32>
    %3 = tpu.matmul %1, %2, %cst {dimension_numbers = #tpu.dot_dimension_numbers<[1], [0], [0], [1], [0, 0, 1, 1], [], []>} : vector<16x33xbf16>, vector<33x256xbf16>, vector<16x256xf32> -> vector<16x256xf32>
    %c0_3 = arith.constant 0 : index
    %c0_4 = arith.constant 0 : index
    %4 = vector.load %arg3[%c0_3, %c0_4] : memref<1x256xf32, #tpu.memory_space<vmem>>, vector<1x256xf32>
    %5 = vector.broadcast %4 : vector<1x256xf32> to vector<16x256xf32>
    %6 = arith.addf %3, %5 : vector<16x256xf32>
    %cst_5 = arith.constant 0.000000e+00 : f32
    %7 = vector.broadcast %cst_5 : f32 to vector<16x256xf32>
    %8 = arith.maximumf %6, %7 : vector<16x256xf32>
    %9 = arith.truncf %8 : vector<16x256xf32> to vector<16x256xbf16>
    %c0_6 = arith.constant 0 : index
    %c0_7 = arith.constant 0 : index
    %10 = vector.load %arg4[%c0_6, %c0_7] : memref<256x128xbf16, #tpu.memory_space<vmem>>, vector<256x128xbf16>
    %cst_8 = arith.constant dense<0.000000e+00> : vector<16x128xf32>
    %11 = tpu.matmul %9, %10, %cst_8 {dimension_numbers = #tpu.dot_dimension_numbers<[1], [0], [0], [1], [0, 0, 1, 1], [], []>} : vector<16x256xbf16>, vector<256x128xbf16>, vector<16x128xf32> -> vector<16x128xf32>
    %c0_9 = arith.constant 0 : index
    %c0_10 = arith.constant 0 : index
    %12 = vector.load %arg5[%c0_9, %c0_10] : memref<1x128xf32, #tpu.memory_space<vmem>>, vector<1x128xf32>
    %13 = vector.broadcast %12 : vector<1x128xf32> to vector<16x128xf32>
    %14 = arith.addf %11, %13 : vector<16x128xf32>
    %cst_11 = arith.constant 0.000000e+00 : f32
    %15 = vector.broadcast %cst_11 : f32 to vector<16x128xf32>
    %16 = arith.maximumf %14, %15 : vector<16x128xf32>
    %17 = arith.truncf %16 : vector<16x128xf32> to vector<16x128xbf16>
    %c0_12 = arith.constant 0 : index
    %c0_13 = arith.constant 0 : index
    %18 = vector.load %arg6[%c0_12, %c0_13] : memref<128x128xbf16, #tpu.memory_space<vmem>>, vector<128x128xbf16>
    %cst_14 = arith.constant dense<0.000000e+00> : vector<16x128xf32>
    %19 = tpu.matmul %17, %18, %cst_14 {dimension_numbers = #tpu.dot_dimension_numbers<[1], [0], [0], [1], [0, 0, 1, 1], [], []>} : vector<16x128xbf16>, vector<128x128xbf16>, vector<16x128xf32> -> vector<16x128xf32>
    %c0_15 = arith.constant 0 : index
    %c0_16 = arith.constant 0 : index
    %20 = vector.load %arg7[%c0_15, %c0_16] : memref<1x128xf32, #tpu.memory_space<vmem>>, vector<1x128xf32>
    %21 = vector.broadcast %20 : vector<1x128xf32> to vector<16x128xf32>
    %22 = arith.addf %19, %21 : vector<16x128xf32>
    %23 = math.tanh %22 : vector<16x128xf32>
    %c0_17 = arith.constant 0 : index
    %c0_18 = arith.constant 0 : index
    %24 = vector.load %arg8[%c0_17, %c0_18] : memref<16x128xf32, #tpu.memory_space<vmem>>, vector<16x128xf32>
    tpu.vector_store %arg8[%c0_17, %c0_18], %23 {strides = array<i32>} : memref<16x128xf32, #tpu.memory_space<vmem>>, vector<16x128xf32>,
    return
  }
  func.func @transform_0(%arg0: i32) -> (i32, i32) {
    %c0_i32 = arith.constant 0 : i32
    %c0_i32_0 = arith.constant 0 : i32
    return %arg0, %c0_i32 : i32, i32
  }
  func.func @transform_1(%arg0: i32) -> (i32, i32) {
    %c0_i32 = arith.constant 0 : i32
    %c0_i32_0 = arith.constant 0 : i32
    %c0_i32_1 = arith.constant 0 : i32
    return %c0_i32, %c0_i32_0 : i32, i32
  }
  func.func @transform_2(%arg0: i32) -> (i32, i32) {
    %c0_i32 = arith.constant 0 : i32
    %c0_i32_0 = arith.constant 0 : i32
    %c0_i32_1 = arith.constant 0 : i32
    return %c0_i32, %c0_i32_0 : i32, i32
  }
  func.func @transform_3(%arg0: i32) -> (i32, i32) {
    %c0_i32 = arith.constant 0 : i32
    %c0_i32_0 = arith.constant 0 : i32
    %c0_i32_1 = arith.constant 0 : i32
    return %c0_i32, %c0_i32_0 : i32, i32
  }
  func.func @transform_4(%arg0: i32) -> (i32, i32) {
    %c0_i32 = arith.constant 0 : i32
    %c0_i32_0 = arith.constant 0 : i32
    %c0_i32_1 = arith.constant 0 : i32
    return %c0_i32, %c0_i32_0 : i32, i32
  }
  func.func @transform_5(%arg0: i32) -> (i32, i32) {
    %c0_i32 = arith.constant 0 : i32
    %c0_i32_0 = arith.constant 0 : i32
    %c0_i32_1 = arith.constant 0 : i32
    return %c0_i32, %c0_i32_0 : i32, i32
  }
  func.func @transform_6(%arg0: i32) -> (i32, i32) {
    %c0_i32 = arith.constant 0 : i32
    %c0_i32_0 = arith.constant 0 : i32
    %c0_i32_1 = arith.constant 0 : i32
    return %c0_i32, %c0_i32_0 : i32, i32
  }
  func.func @transform_7(%arg0: i32) -> (i32, i32) {
    %c0_i32 = arith.constant 0 : i32
    %c0_i32_0 = arith.constant 0 : i32
    return %arg0, %c0_i32 : i32, i32
  }
}

</mosaic_0001>

<bundles_post_ra>
// kernel: actor_forward.1
= control target key start
LH: loop header
LB: loop body
LE: loop exit
PB: predicated region body
PF: predicated region fallthrough
CT: control target
= control target key end

     0   :  { %12 = vsyncpa [#allocation3], 0  ;;  %s838_s0 = inlined_call_operand.hbm [shape: f32[8,33], index: 0, kind: input, shape index: {}]   ;;  %s839_s1 = inlined_call_operand.hbm [shape: bf16[33,256], index: 1, kind: input, shape index: {}]   ;;  %s840_s2 = inlined_call_operand.hbm [shape: f32[1,256], index: 2, kind: input, shape index: {}]   ;;  %s841_s3 = inlined_call_operand.hbm [shape: bf16[256,128], index: 3, kind: input, shape index: {}]   ;;  %s842_s4 = inlined_call_operand.vmem [shape: f32[1,128], index: 4, kind: input, shape index: {}]   ;;  %s843_s5 = inlined_call_operand.hbm [shape: bf16[128,128], index: 5, kind: input, shape index: {}]   ;;  %s844_s6 = inlined_call_operand.vmem [shape: f32[1,128], index: 6, kind: input, shape index: {}]   ;;  %s845_s7 = inlined_call_operand.vmem [shape: f32[8,128], index: 7, kind: output, shape index: {}]  }
   0x1   :  { %13 = vsyncpa [#allocation5], 0 }
   0x2   :  { %14 = vsyncpa [#allocation8], 0 }
   0x3   :  { %18 = vsyncadd [#allocation3], 128  ;;  %s32_s26 = sshll.u32 %s839_s1, 4  ;;  %s764_s27 = smov [#allocation4]   ;;  %s33_s26 = int_to_ptr.hbm [resolvable:$true] %s32_s26 }
   0x4   :  { %s34_s28 = sshll.u32 %s764_s27, 4  ;;  %s56_s8 = sshll.u32 %s841_s3, 4  ;;  %s35_s28 = int_to_ptr.vmem [resolvable:$true] %s34_s28  ;;  %s57_s8 = int_to_ptr.hbm [resolvable:$true] %s56_s8 }
   0x5   :  { %s765_s9 = smov 128   ;;  %s766_s10 = smov 8  }
   0x6   :  { %40 = dma.hbm_to_vmem [thread:$0]  %s33_s26, 640, %s35_s28, [#allocation5], %s765_s9, %s765_s9, %s766_s10  }
   0x7   :  { %s767_s11 = smov [#allocation7]   ;;  %s768_s13 = smov 64  }
   0x8   :  { %s58_s12 = sshll.u32 %s767_s11, 4  ;;  %s769_s14 = smov 4   ;;  %s59_s12 = int_to_ptr.vmem [resolvable:$true] %s58_s12 }
   0x9   :  { %64 = dma.hbm_to_vmem [thread:$0]  %s57_s8, 2048, %s59_s12, [#allocation8], %s768_s13, %s768_s13, %s769_s14  }
   0xa   :  { %s19_s16 = sshll.u32 %s838_s0, 4  ;;  %s770_s17 = smov [#allocation2]   ;;  %s20_s16 = int_to_ptr.hbm [resolvable:$true] %s19_s16 }
   0xb   :  { %s21_s18 = sshll.u32 %s770_s17, 4  ;;  %s46_s20 = sshll.u32 %s840_s2, 4  ;;  %s22_s18 = int_to_ptr.vmem [resolvable:$true] %s21_s18  ;;  %s47_s20 = int_to_ptr.hbm [resolvable:$true] %s46_s20 }
   0xc   :  { %27 = dma.hbm_to_vmem [thread:$0]  %s20_s16, 128, %s22_s18, [#allocation3], %s765_s9, %s765_s9, %s766_s10  }
   0xd   :  { %s771_s21 = smov [#allocation6]   ;;  %s71_s25 = sshll.u32 %s843_s5, 4  ;;  %s72_s25 = int_to_ptr.hbm [resolvable:$true] %s71_s25 }
   0xe   :  { %s48_s22 = sshll.u32 %s771_s21, 4  ;;  %s772_s0 = smov [#allocation9]   ;;  %s49_s22 = int_to_ptr.vmem [resolvable:$true] %s48_s22 }
   0xf   :  { %51 = dma.hbm_to_vmem [thread:$0]  %s47_s20, 32, %s49_s22, [#allocation5]  }
  0x10   :  { %s73_s26 = sshll.u32 %s772_s0, 4  ;;  %s74_s26 = int_to_ptr.vmem [resolvable:$true] %s73_s26 }
  0x11   :  { %79 = dma.hbm_to_vmem [thread:$0]  %s72_s25, 1024, %s74_s26, [#allocation8], %s768_s13, %s768_s13, %s769_s14  }
  0x12   :  { %758 = dma.done.wait [#allocation3], 256  }
  0x13   :  { %759 = vsyncadd [#allocation3], 4294967040 }
  0x14   :  { %760 = dma.done.wait [#allocation5], 672  }
  0x15   :  { %761 = vsyncadd [#allocation5], 4294966624 }
  0x16   :  { %762 = dma.done.wait [#allocation8], 3072  }
  0x17   :  { %763 = vsyncadd [#allocation8], 4294964224  ;;  %vm146_vm0 = vcmask 1040384   ;;  %v110_v0 = vld [vmem:[#allocation4 + $0x20] sm:$0x11]  ;;  %v773_v2 = vmov 0  }
  0x18   :  { %v130_v1 = vunpack.c.l.b16 %v110_v0  ;;  %v148_v3 = vsel %vm146_vm0, 65535, %v773_v2  ;;  %v607_v5 = vld [vmem:[#allocation7 + $0x38] sm:$0xff]  ;;  %v492_v6 = vld [vmem:[#allocation4 + $0x10] sm:$0xf]  ;;  %v599_v7 = vld [vmem:[#allocation4 + $0x14] sm:$0xf0]  ;;  %v131_v8 = vunpack.c.h.b16 %v110_v0 }
  0x19   :  { %321 = vmatpush.bf16.msra.mxu2 %v607_v5  ;;  %v606_v10 = vld [vmem:[#allocation7 + $0x30] sm:$0xff]  ;;  %v493_v11 = vor.u32 %v599_v7, %v492_v6  ;;  %v597_v13 = vld [vmem:[#allocation4 + $0x4] sm:$0xf0]  ;;  %v605_v15 = vld [vmem:[#allocation7 + $0x28] sm:$0xff]  ;;  %vm142_vm1 = vcmask 269312  }
  0x1a   :  { %v136_v4 = vpack.c.b16 %v130_v1, %v130_v1  ;;  %v484_v12 = vld [vmem:[#allocation4] sm:$0xf]  ;;  %v137_v14 = vpack.c.b16 %v131_v8, %v131_v8  ;;  %v103_v17 = vld [vmem:[#allocation2] sm:$0xff]  ;;  %v104_v18 = vld [vmem:[#allocation2 + $0x8] sm:$0xff] }
  0x1b   :  { %v485_v16 = vor.u32 %v597_v13, %v484_v12  ;;  %v598_v20 = vld [vmem:[#allocation4 + $0x14] sm:$0xf]  ;;  %v494_v21 = vld [vmem:[#allocation4 + $0x18] sm:$0xf0]  ;;  %v604_v22 = vld [vmem:[#allocation7 + $0x20] sm:$0xff]  ;;  %v105_v23 = vpack.c.bf16 %v104_v18, %v103_v17 }
  0x1c   :  { %v150_v9 = vand.u32 %v148_v3, %v136_v4  ;;  %v153_v19 = vand.u32 %v148_v3, %v137_v14  ;;  %v497_v24 = vor.u32 %v598_v20, %v494_v21  ;;  %v596_v25 = vld [vmem:[#allocation4 + $0x4] sm:$0xf]  ;;  %v486_v26 = vld [vmem:[#allocation4 + $0x8] sm:$0xf0]  ;;  %v602_v30 = vld [vmem:[#allocation7 + $0x10] sm:$0xff] }
  0x1d   :  { %322 = vmatpush.bf16.msra.mxu2 %v606_v10  ;;  %v489_v27 = vor.u32 %v596_v25, %v486_v26  ;;  %v603_v28 = vld [vmem:[#allocation7 + $0x18] sm:$0xff]  ;;  %v614_v31 = vld [vmem:[#allocation7 + $0x70] sm:$0xff]  ;;  %v601_v32 = vld [vmem:[#allocation7 + $0x8] sm:$0xff] }
  0x1e   :  { %160 = vmatpush.bf16.msra.mxu1 %v150_v9  ;;  %v615_v29 = vld [vmem:[#allocation7 + $0x78] sm:$0xff]  ;;  %v613_v33 = vld [vmem:[#allocation7 + $0x68] sm:$0xff]  ;;  %v600_v34 = vld [vmem:[#allocation7] sm:$0xff] }
  0x1f   :  { %335 = vmatpush.bf16.msra.mxu3 %v615_v29  ;;  %v612_v35 = vld [vmem:[#allocation7 + $0x60] sm:$0xff]  ;;  %v611_v36 = vld [vmem:[#allocation7 + $0x58] sm:$0xff]  ;;  %v610_v37 = vld [vmem:[#allocation7 + $0x50] sm:$0xff] }
  0x20   :  { %v609_v38 = vld [vmem:[#allocation7 + $0x48] sm:$0xff]  ;;  %v608_v39 = vld [vmem:[#allocation7 + $0x40] sm:$0xff]  ;;  %v111_v40 = vld [vmem:[#allocation6] sm:$0x3] }
  0x21   :  { %323 = vmatpush.bf16.msra.mxu2 %v605_v15  ;;  %v113_v42 = vperm.slane %v111_v40, 0  ;;  %v114_v50 = vperm.slane %v111_v40, 1  ;;  %v623_v57 = vld [vmem:[#allocation9 + $0x38] sm:$0xff]  ;;  %v622_v58 = vld [vmem:[#allocation9 + $0x30] sm:$0xff]  ;;  %v621_v59 = vld [vmem:[#allocation9 + $0x28] sm:$0xff] }
  0x22   :  { %161 = vmatpush.bf16.msra.mxu1 %v493_v11  ;;  %420 = vmatpush.bf16.msra.mxu0 %v623_v57  ;;  %v620_v60 = vld [vmem:[#allocation9 + $0x20] sm:$0xff]  ;;  %v619_v61 = vld [vmem:[#allocation9 + $0x18] sm:$0xff]  ;;  %v618_v62 = vld [vmem:[#allocation9 + $0x10] sm:$0xff] }
  0x23   :  { %336 = vmatpush.bf16.msra.mxu3 %v614_v31  ;;  %v617_v63 = vld [vmem:[#allocation9 + $0x8] sm:$0xff]  ;;  %v616_v0 = vld [vmem:[#allocation9] sm:$0xff] }
  0x24   :  { %v634_v3 = vld [vmem:[%s842_s4] ss:$0 sm:$0xff] }
  0x25   :  { %324 = vmatpush.bf16.msra.mxu2 %v604_v22  ;;  %v635_v13 = vld [vmem:[%s844_s6] ss:$0 sm:$0xff] }
  0x26   :  { %162 = vmatpush.bf16.msra.mxu1 %v485_v16  ;;  %421 = vmatpush.bf16.msra.mxu0 %v622_v58 }
  0x27   :  { %337 = vmatpush.bf16.msra.mxu3 %v613_v33 }
  0x29   :  { %498 = vmatmul.msk.bf16.vlgmr.msra.gmra.mxu1 %vm142_vm1, %v105_v23  ;;  %325 = vmatpush.bf16.msra.mxu2 %v603_v28 }
  0x2a   :  { %174 = vmatpush.bf16.msrb.mxu1 %v153_v19  ;;  %422 = vmatpush.bf16.msra.mxu0 %v621_v59 }
  0x2b   :  { %338 = vmatpush.bf16.msra.mxu3 %v612_v35 }
  0x2d   :  { %326 = vmatpush.bf16.msra.mxu2 %v602_v30 }
  0x2e   :  { %175 = vmatpush.bf16.msrb.mxu1 %v497_v24  ;;  %423 = vmatpush.bf16.msra.mxu0 %v620_v60 }
  0x2f   :  { %339 = vmatpush.bf16.msra.mxu3 %v611_v36 }
  0x31   :  { %327 = vmatpush.bf16.msra.mxu2 %v601_v32 }
  0x32   :  { %176 = vmatpush.bf16.msrb.mxu1 %v489_v27  ;;  %424 = vmatpush.bf16.msra.mxu0 %v619_v61 }
  0x33   :  { %340 = vmatpush.bf16.msra.mxu3 %v610_v37 }
  0x35   :  { %328 = vmatpush.bf16.msra.mxu2 %v600_v34 }
  0x36   :  { %425 = vmatpush.bf16.msra.mxu0 %v618_v62 }
  0x37   :  { %341 = vmatpush.bf16.msra.mxu3 %v609_v38 }
  0x39   :  { %499 = vmatmul.msk.bf16.vlgmr.msrb.gmra.mxu1 %vm142_vm1, %v105_v23 }
  0x3a   :  { %426 = vmatpush.bf16.msra.mxu0 %v617_v63 }
  0x3b   :  { %342 = vmatpush.bf16.msra.mxu3 %v608_v39 }
  0x3e   :  { %427 = vmatpush.bf16.msra.mxu0 %v616_v0 }
  0xa6   :  { %v164_v41 = vpop.f32.mrf.mxu1 }
  0xa7   :  { %v165_v43 = vadd.f32 %v164_v41, %v113_v42 }
  0xa9   :  { %v183_v46 = vmax.f32 %v165_v43, 0.0 }
  0xae   :  { %v166_v44 = vpop.f32.mrf.mxu1 }
  0xaf   :  { %v167_v45 = vadd.f32 %v166_v44, %v113_v42 }
  0xb1   :  { %v185_v47 = vmax.f32 %v167_v45, 0.0 }
  0xb3   :  { %v187_v48 = vpack.c.bf16 %v185_v47, %v183_v46 }
  0xb5   :  { %329 = vmatmul.bf16.vlgmr.msra.gmra.mxu2 %v187_v48 }
  0xb6   :  { %v178_v49 = vpop.f32.mrf.mxu1 }
  0xb7   :  { %v179_v51 = vadd.f32 %v178_v49, %v114_v50 }
  0xb9   :  { %v184_v54 = vmax.f32 %v179_v51, 0.0 }
  0xbe   :  { %v180_v52 = vpop.f32.mrf.mxu1 }
  0xbf   :  { %v181_v53 = vadd.f32 %v180_v52, %v114_v50 }
  0xc1   :  { %v186_v55 = vmax.f32 %v181_v53, 0.0 }
  0xc3   :  { %v188_v56 = vpack.c.bf16 %v186_v55, %v184_v54 }
  0xc5   :  { %343 = vmatmul.bf16.vlgmr.msra.gmra.mxu3 %v188_v56 }
 0x138   :  { %v330_v1 = vpop.f32.mrf.mxu2 }
 0x139   :  { %v331_v5 = vadd.f32 %v634_v3, %v330_v1 }
 0x140   :  { %v332_v4 = vpop.f32.mrf.mxu2 }
 0x141   :  { %v333_v6 = vadd.f32 %v634_v3, %v332_v4 }
 0x148   :  { %v344_v2 = vpop.f32.mrf.mxu3 }
 0x149   :  { %v345_v7 = vadd.f32 %v344_v2, %v331_v5 }
 0x14b   :  { %v349_v10 = vmax.f32 %v345_v7, 0.0 }
 0x150   :  { %v346_v8 = vpop.f32.mrf.mxu3 }
 0x151   :  { %v347_v9 = vadd.f32 %v346_v8, %v333_v6 }
 0x153   :  { %v350_v11 = vmax.f32 %v347_v9, 0.0 }
 0x155   :  { %v351_v12 = vpack.c.bf16 %v350_v11, %v349_v10 }
 0x157   :  { %428 = vmatmul.bf16.vlgmr.msra.gmra.mxu0 %v351_v12 }
 0x1d4   :  { %v429_v14 = vpop.f32.mrf.mxu0 }
 0x1d5   :  { %v430_v15 = vadd.f32 %v635_v13, %v429_v14 }
 0x1d7   :  { %636 = vtanh.f32 %v430_v15 }
 0x1dc   :  { %v431_v16 = vpop.f32.mrf.mxu0 }
 0x1dd   :  { %v637_v17 = vpop.eup %636 }
 0x1de   :  { %469 = vst [vmem:[%s845_s7] sm:$0xff] %v637_v17 }
 0x1df   :  { %475 = vsyncpa [#allocation3], 1 }
 0x1e0   :  { %476 = vsyncpa [#allocation5], 1 }
 0x1e1   :  { %477 = vsyncpa [#allocation8], 1 }

</bundles_post_ra>
